<compile_context>
chip_gen: v6e
topology: v6e:2x2x1
jax: 0.10.0
libtpu: 0.0.40
codegen_flags: <defaults>
</compile_context>

<pallas_src>
import math

import jax
import jax.numpy as jnp
from jax.experimental import pallas as pl
from jax.experimental.pallas import tpu as pltpu

NEG_SLOPE = 0.01  # torch nn.LeakyReLU default


def _leaky_relu(x):
    return jnp.where(x > 0, x, NEG_SLOPE * x)


def _round_up(v, m):
    return ((v + m - 1) // m) * m


def _cdiv(a, b):
    return -(-a // b)


# ----------------------------------------------------------------------------
# Kernel
# ----------------------------------------------------------------------------
def simple_model_kernel(
    x_ref,
    w1_ref, b1_ref,
    w2_ref, b2_ref,
    wh_ref, bh_ref,      # fused [action | value] head
    out_ref,
):
    """Fused MLP forward: 2x (Linear + LeakyReLU) + one fused head matmul.

    Matmuls feed bf16 operands to the MXU (weights are stored bf16; the
    activation is cast in-register so the HBM read of x stays at its input
    dtype). Bias add + LeakyReLU run in f32 on the VPU.
    """
    cdt = w1_ref.dtype  # compute dtype for MXU operands (bf16)

    x = x_ref[...].astype(cdt)
    h = jnp.dot(x, w1_ref[...], preferred_element_type=jnp.float32) + b1_ref[...]
    h = _leaky_relu(h)

    h = jnp.dot(h.astype(cdt), w2_ref[...], preferred_element_type=jnp.float32) + b2_ref[...]
    h = _leaky_relu(h)

    out_ref[...] = (
        jnp.dot(h.astype(cdt), wh_ref[...], preferred_element_type=jnp.float32) + bh_ref[...]
    ).astype(out_ref.dtype)


# ----------------------------------------------------------------------------
# Wrapper
# ----------------------------------------------------------------------------
def _choose_batch_tiling(batch, max_batch_tile):
    """Pick (tile_rows, num_tiles).

    - Small batches (<= 512): one tile (block dim == full array dim), avoids
      per-grid-step overhead.
    - Larger batches: at least 2 tiles (keeps both v7x TensorCores busy), tile
      rows rounded up to a multiple of 8; the last grid block may be ragged
      (Pallas masks it), so waste is bounded to < 8 rows.
    """
    if batch <= 512:
        return batch, 1
    n_tiles = max(2, _cdiv(batch, max_batch_tile))
    tb = _round_up(_cdiv(batch, n_tiles), 8)
    n_tiles = _cdiv(batch, tb)  # ragged last tile allowed
    return tb, n_tiles


def _fused_ref(x, prepared_params):
    """Matched-precision plain-JAX forward of the fused (act|value) head."""
    w1, b1, w2, b2, wh, bh = prepared_params
    cdt = w1.dtype
    h = _leaky_relu(jnp.dot(x.astype(cdt), w1, preferred_element_type=jnp.float32) + b1)
    h = _leaky_relu(jnp.dot(h.astype(cdt), w2, preferred_element_type=jnp.float32) + b2)
    return jnp.dot(h.astype(cdt), wh, preferred_element_type=jnp.float32) + bh


def simple_model_forward(x, prepared_params, *, max_batch_tile=4096, min_pallas_batch=0):
    """Returns (action_logits [B, num_outputs], value [B])."""
    w1, b1, w2, b2, wh, bh = prepared_params
    batch, obs_dim = x.shape
    hidden = w1.shape[1]
    n_head = wh.shape[1]          # num_outputs + 1 (fused action + value)
    num_outputs = n_head - 1

    if batch < min_pallas_batch:
        # Tiny-batch path: a pallas_call would be pure launch/fixed overhead.
        out = _fused_ref(x, prepared_params)
    else:
        tb, n_tiles = _choose_batch_tiling(batch, max_batch_tile)

        flops = 2 * batch * (obs_dim * hidden + hidden * hidden + hidden * n_head)
        bytes_accessed = (
            x.dtype.itemsize * batch * obs_dim                      # x in
            + 4 * batch * n_head                                    # fused out (f32)
            + w1.dtype.itemsize * (obs_dim * hidden + hidden * hidden + hidden * n_head)
            + 4 * (2 * hidden + n_head)                             # biases (f32)
        )

        out = pl.pallas_call(
            simple_model_kernel,
            out_shape=jax.ShapeDtypeStruct((batch, n_head), jnp.float32),
            grid_spec=pltpu.PrefetchScalarGridSpec(
                num_scalar_prefetch=0,
                grid=(n_tiles,),
                in_specs=[
                    # batch-tiled activation input (pipelined / double-buffered;
                    # ragged last block masked by Pallas -> no jnp.pad copy)
                    pl.BlockSpec((tb, obs_dim), lambda i: (i, 0)),
                    # weights & biases: constant index_map -> resident in VMEM,
                    # DMA'd from HBM only once across the whole grid.
                    pl.BlockSpec((obs_dim, hidden), lambda i: (0, 0)),
                    pl.BlockSpec((1, hidden), lambda i: (0, 0)),
                    pl.BlockSpec((hidden, hidden), lambda i: (0, 0)),
                    pl.BlockSpec((1, hidden), lambda i: (0, 0)),
                    pl.BlockSpec((hidden, n_head), lambda i: (0, 0)),
                    pl.BlockSpec((1, n_head), lambda i: (0, 0)),
                ],
                out_specs=pl.BlockSpec((tb, n_head), lambda i: (i, 0)),
            ),
            compiler_params=pltpu.CompilerParams(
                dimension_semantics=("parallel",),   # shard batch tiles across TCs (v7x)
            ),
            cost_estimate=pl.CostEstimate(
                flops=flops, transcendentals=0, bytes_accessed=bytes_accessed
            ),
        )(x, w1, b1, w2, b2, wh, bh)

    act = out[:, :num_outputs]
    val = out[:, num_outputs]     # .squeeze(-1) of the value head output
    return act, val


# ----------------------------------------------------------------------------
# Parameter init (matches PyTorch xavier_normal_(gain=leaky_relu) + zero bias)
# ----------------------------------------------------------------------------
def xavier_normal(key, fan_in, fan_out, gain):
    std = gain * math.sqrt(2.0 / (fan_in + fan_out))
    # stored as (in, out) so the kernel does x @ W
    return std * jax.random.normal(key, (fan_in, fan_out), dtype=jnp.float32)


def init_params(key, obs_dim, hidden_size, num_outputs):
    # torch.nn.init.calculate_gain('leaky_relu') with default negative_slope=0.01
    gain = math.sqrt(2.0 / (1.0 + NEG_SLOPE ** 2))
    k1, k2, k3, k4 = jax.random.split(key, 4)
    w1 = xavier_normal(k1, obs_dim, hidden_size, gain)
    b1 = jnp.zeros((1, hidden_size), jnp.float32)
    w2 = xavier_normal(k2, hidden_size, hidden_size, gain)
    b2 = jnp.zeros((1, hidden_size), jnp.float32)
    wa = xavier_normal(k3, hidden_size, num_outputs, gain)
    ba = jnp.zeros((1, num_outputs), jnp.float32)
    wv = xavier_normal(k4, hidden_size, 1, gain)
    bv = jnp.zeros((1, 1), jnp.float32)
    return (w1, b1, w2, b2, wa, ba, wv, bv)


def prepare_params(raw_params, compute_dtype=jnp.bfloat16):
    """One-time fusion of action/value heads + weight cast to the MXU dtype."""
    w1, b1, w2, b2, wa, ba, wv, bv = raw_params
    wh = jnp.concatenate([wa, wv], axis=1)
    bh = jnp.concatenate([ba, bv], axis=1)
    return (
        w1.astype(compute_dtype), b1.astype(jnp.float32),
        w2.astype(compute_dtype), b2.astype(jnp.float32),
        wh.astype(compute_dtype), bh.astype(jnp.float32),
    )


# ----------------------------------------------------------------------------
# Demo / checks
# ----------------------------------------------------------------------------
if __name__ == "__main__":
    batch, obs_dim, hidden_size, num_outputs = 8, 32, 32, 8

    key = jax.random.PRNGKey(0)
    pkey, xkey = jax.random.split(key)
    raw_params = init_params(pkey, obs_dim, hidden_size, num_outputs)
    params = prepare_params(raw_params)
    x = jax.random.normal(xkey, (batch, obs_dim), dtype=jnp.float32)

    fwd = jax.jit(simple_model_forward)
    action_logits, value_out = fwd(x, params)
    jax.block_until_ready((action_logits, value_out))
    assert action_logits.shape == (batch, num_outputs)
    assert value_out.shape == (batch,)

    # matched-precision (bf16 matmul, f32 elementwise) reference
    ref = _fused_ref(x, params)
    assert jnp.allclose(action_logits, ref[:, :num_outputs], atol=1e-3, rtol=1e-3)
    assert jnp.allclose(value_out, ref[:, num_outputs], atol=1e-3, rtol=1e-3)

    # loose check against full-f32 PyTorch-equivalent math (bf16 numerics change)
    w1, b1, w2, b2, wa, ba, wv, bv = raw_params
    h = _leaky_relu(x @ w1 + b1)
    h = _leaky_relu(h @ w2 + b2)
    assert jnp.allclose(action_logits, h @ wa + ba, atol=5e-2, rtol=5e-2)
    assert jnp.allclose(value_out, (h @ wv + bv)[:, 0], atol=5e-2, rtol=5e-2)

    # single-tile path with batch not a multiple of 8 (block dim == full dim)
    x2 = jax.random.normal(jax.random.PRNGKey(1), (333, obs_dim), jnp.float32)
    a2, v2 = fwd(x2, params)
    jax.block_until_ready((a2, v2))
    r2 = _fused_ref(x2, params)
    assert not jnp.any(jnp.isnan(a2)) and not jnp.any(jnp.isnan(v2))
    assert jnp.allclose(a2, r2[:, :num_outputs], atol=1e-3, rtol=1e-3)
    assert jnp.allclose(v2, r2[:, num_outputs], atol=1e-3, rtol=1e-3)

    # multi-tile path (grid=2, both TCs) with a ragged, masked last block
    x3 = jax.random.normal(jax.random.PRNGKey(2), (2500, obs_dim), jnp.float32)
    a3, v3 = fwd(x3, params)
    jax.block_until_ready((a3, v3))
    r3 = _fused_ref(x3, params)
    assert not jnp.any(jnp.isnan(a3)) and not jnp.any(jnp.isnan(v3))
    assert jnp.allclose(a3, r3[:, :num_outputs], atol=1e-3, rtol=1e-3)
    assert jnp.allclose(v3, r3[:, num_outputs], atol=1e-3, rtol=1e-3)

    print("KERNEL_OK")
</pallas_src>

<mosaic_0001>
module attributes {stable_mosaic.version = 11 : i64} {
  func.func @simple_model_kernel(%arg0: i32, %arg1: memref<8x32xf32, #tpu.memory_space<vmem>>, %arg2: memref<32x32xbf16, #tpu.memory_space<vmem>>, %arg3: memref<1x32xf32, #tpu.memory_space<vmem>>, %arg4: memref<32x32xbf16, #tpu.memory_space<vmem>>, %arg5: memref<1x32xf32, #tpu.memory_space<vmem>>, %arg6: memref<32x9xbf16, #tpu.memory_space<vmem>>, %arg7: memref<1x9xf32, #tpu.memory_space<vmem>>, %arg8: memref<8x9xf32, #tpu.memory_space<vmem>>) attributes {dimension_semantics = [#tpu.dimension_semantics<parallel>], iteration_bounds = array<i64: 1>, scalar_prefetch = 0 : i64, scratch_operands = 0 : i64, tpu.core_type = #tpu.core_type<tc>, window_params = [{transform_indices = @transform_0, window_bounds = array<i64: 8, 32>}, {pipeline_mode = #tpu.pipeline_mode<synchronous>, transform_indices = @transform_1, window_bounds = array<i64: 32, 32>}, {pipeline_mode = #tpu.pipeline_mode<synchronous>, transform_indices = @transform_2, window_bounds = array<i64: 1, 32>}, {pipeline_mode = #tpu.pipeline_mode<synchronous>, transform_indices = @transform_3, window_bounds = array<i64: 32, 32>}, {pipeline_mode = #tpu.pipeline_mode<synchronous>, transform_indices = @transform_4, window_bounds = array<i64: 1, 32>}, {pipeline_mode = #tpu.pipeline_mode<synchronous>, transform_indices = @transform_5, window_bounds = array<i64: 32, 9>}, {pipeline_mode = #tpu.pipeline_mode<synchronous>, transform_indices = @transform_6, window_bounds = array<i64: 1, 9>}, {transform_indices = @transform_7, window_bounds = array<i64: 8, 9>}]} {
    %c0 = arith.constant 0 : index
    %c0_0 = arith.constant 0 : index
    %0 = vector.load %arg1[%c0, %c0_0] : memref<8x32xf32, #tpu.memory_space<vmem>>, vector<8x32xf32>
    %1 = arith.truncf %0 : vector<8x32xf32> to vector<8x32xbf16>
    %c0_1 = arith.constant 0 : index
    %c0_2 = arith.constant 0 : index
    %2 = vector.load %arg2[%c0_1, %c0_2] : memref<32x32xbf16, #tpu.memory_space<vmem>>, vector<32x32xbf16>
    %cst = arith.constant dense<0.000000e+00> : vector<8x32xf32>
    %3 = tpu.matmul %1, %2, %cst {dimension_numbers = #tpu.dot_dimension_numbers<[1], [0], [0], [1], [0, 0, 1, 1], [], []>} : vector<8x32xbf16>, vector<32x32xbf16>, vector<8x32xf32> -> vector<8x32xf32>
    %c0_3 = arith.constant 0 : index
    %c0_4 = arith.constant 0 : index
    %4 = vector.load %arg3[%c0_3, %c0_4] : memref<1x32xf32, #tpu.memory_space<vmem>>, vector<1x32xf32>
    %5 = vector.broadcast %4 : vector<1x32xf32> to vector<8x32xf32>
    %6 = arith.addf %3, %5 : vector<8x32xf32>
    %cst_5 = arith.constant 0.000000e+00 : f32
    %7 = vector.broadcast %cst_5 : f32 to vector<8x32xf32>
    %8 = arith.cmpf ogt, %6, %7 : vector<8x32xf32>
    %cst_6 = arith.constant 0.00999999977 : f32
    %9 = vector.broadcast %cst_6 : f32 to vector<8x32xf32>
    %10 = arith.mulf %9, %6 : vector<8x32xf32>
    %11 = arith.select %8, %6, %10 : vector<8x32xi1>, vector<8x32xf32>
    %12 = arith.truncf %11 : vector<8x32xf32> to vector<8x32xbf16>
    %c0_7 = arith.constant 0 : index
    %c0_8 = arith.constant 0 : index
    %13 = vector.load %arg4[%c0_7, %c0_8] : memref<32x32xbf16, #tpu.memory_space<vmem>>, vector<32x32xbf16>
    %cst_9 = arith.constant dense<0.000000e+00> : vector<8x32xf32>
    %14 = tpu.matmul %12, %13, %cst_9 {dimension_numbers = #tpu.dot_dimension_numbers<[1], [0], [0], [1], [0, 0, 1, 1], [], []>} : vector<8x32xbf16>, vector<32x32xbf16>, vector<8x32xf32> -> vector<8x32xf32>
    %c0_10 = arith.constant 0 : index
    %c0_11 = arith.constant 0 : index
    %15 = vector.load %arg5[%c0_10, %c0_11] : memref<1x32xf32, #tpu.memory_space<vmem>>, vector<1x32xf32>
    %16 = vector.broadcast %15 : vector<1x32xf32> to vector<8x32xf32>
    %17 = arith.addf %14, %16 : vector<8x32xf32>
    %cst_12 = arith.constant 0.000000e+00 : f32
    %18 = vector.broadcast %cst_12 : f32 to vector<8x32xf32>
    %19 = arith.cmpf ogt, %17, %18 : vector<8x32xf32>
    %cst_13 = arith.constant 0.00999999977 : f32
    %20 = vector.broadcast %cst_13 : f32 to vector<8x32xf32>
    %21 = arith.mulf %20, %17 : vector<8x32xf32>
    %22 = arith.select %19, %17, %21 : vector<8x32xi1>, vector<8x32xf32>
    %23 = arith.truncf %22 : vector<8x32xf32> to vector<8x32xbf16>
    %c0_14 = arith.constant 0 : index
    %c0_15 = arith.constant 0 : index
    %24 = vector.load %arg6[%c0_14, %c0_15] : memref<32x9xbf16, #tpu.memory_space<vmem>>, vector<32x9xbf16>
    %cst_16 = arith.constant dense<0.000000e+00> : vector<8x9xf32>
    %25 = tpu.matmul %23, %24, %cst_16 {dimension_numbers = #tpu.dot_dimension_numbers<[1], [0], [0], [1], [0, 0, 1, 1], [], []>} : vector<8x32xbf16>, vector<32x9xbf16>, vector<8x9xf32> -> vector<8x9xf32>
    %c0_17 = arith.constant 0 : index
    %c0_18 = arith.constant 0 : index
    %26 = vector.load %arg7[%c0_17, %c0_18] : memref<1x9xf32, #tpu.memory_space<vmem>>, vector<1x9xf32>
    %27 = vector.broadcast %26 : vector<1x9xf32> to vector<8x9xf32>
    %28 = arith.addf %25, %27 : vector<8x9xf32>
    %c0_19 = arith.constant 0 : index
    %c0_20 = arith.constant 0 : index
    %29 = vector.load %arg8[%c0_19, %c0_20] : memref<8x9xf32, #tpu.memory_space<vmem>>, vector<8x9xf32>
    tpu.vector_store %arg8[%c0_19, %c0_20], %28 {strides = array<i32>} : memref<8x9xf32, #tpu.memory_space<vmem>>, vector<8x9xf32>,
    return
  }
  func.func @transform_0(%arg0: i32) -> (i32, i32) {
    %c0_i32 = arith.constant 0 : i32
    %c0_i32_0 = arith.constant 0 : i32
    return %arg0, %c0_i32 : i32, i32
  }
  func.func @transform_1(%arg0: i32) -> (i32, i32) {
    %c0_i32 = arith.constant 0 : i32
    %c0_i32_0 = arith.constant 0 : i32
    %c0_i32_1 = arith.constant 0 : i32
    return %c0_i32, %c0_i32_0 : i32, i32
  }
  func.func @transform_2(%arg0: i32) -> (i32, i32) {
    %c0_i32 = arith.constant 0 : i32
    %c0_i32_0 = arith.constant 0 : i32
    %c0_i32_1 = arith.constant 0 : i32
    return %c0_i32, %c0_i32_0 : i32, i32
  }
  func.func @transform_3(%arg0: i32) -> (i32, i32) {
    %c0_i32 = arith.constant 0 : i32
    %c0_i32_0 = arith.constant 0 : i32
    %c0_i32_1 = arith.constant 0 : i32
    return %c0_i32, %c0_i32_0 : i32, i32
  }
  func.func @transform_4(%arg0: i32) -> (i32, i32) {
    %c0_i32 = arith.constant 0 : i32
    %c0_i32_0 = arith.constant 0 : i32
    %c0_i32_1 = arith.constant 0 : i32
    return %c0_i32, %c0_i32_0 : i32, i32
  }
  func.func @transform_5(%arg0: i32) -> (i32, i32) {
    %c0_i32 = arith.constant 0 : i32
    %c0_i32_0 = arith.constant 0 : i32
    %c0_i32_1 = arith.constant 0 : i32
    return %c0_i32, %c0_i32_0 : i32, i32
  }
  func.func @transform_6(%arg0: i32) -> (i32, i32) {
    %c0_i32 = arith.constant 0 : i32
    %c0_i32_0 = arith.constant 0 : i32
    %c0_i32_1 = arith.constant 0 : i32
    return %c0_i32, %c0_i32_0 : i32, i32
  }
  func.func @transform_7(%arg0: i32) -> (i32, i32) {
    %c0_i32 = arith.constant 0 : i32
    %c0_i32_0 = arith.constant 0 : i32
    return %arg0, %c0_i32 : i32, i32
  }
}

</mosaic_0001>

<bundles_post_ra>
// kernel: simple_model_forward.1
= control target key start
LH: loop header
LB: loop body
LE: loop exit
PB: predicated region body
PF: predicated region fallthrough
CT: control target
= control target key end

     0   :  { %12 = vsyncpa [#allocation3], 0  ;;  %s450_s0 = inlined_call_operand.vmem [shape: f32[8,32], index: 0, kind: input, shape index: {}]   ;;  %s451_s1 = inlined_call_operand.vmem [shape: bf16[32,32], index: 1, kind: input, shape index: {}]   ;;  %s452_s2 = inlined_call_operand.vmem [shape: f32[1,32], index: 2, kind: input, shape index: {}]   ;;  %s453_s3 = inlined_call_operand.hbm [shape: bf16[32,32], index: 3, kind: input, shape index: {}]   ;;  %s454_s4 = inlined_call_operand.hbm [shape: f32[1,32], index: 4, kind: input, shape index: {}]   ;;  %s455_s5 = inlined_call_operand.vmem [shape: bf16[32,9], index: 5, kind: input, shape index: {}]   ;;  %s456_s6 = inlined_call_operand.vmem [shape: f32[1,9], index: 6, kind: input, shape index: {}]   ;;  %s457_s7 = inlined_call_operand.vmem [shape: f32[8,9], index: 7, kind: output, shape index: {}]  }
   0x1   :  { %13 = vsyncpa [#allocation5], 0  ;;  %s371_s24 = smov [#allocation2]  }
   0x2   :  { %s25_s25 = sshll.u32 %s371_s24, 4  ;;  %s26_s25 = int_to_ptr.vmem [resolvable:$true] %s25_s25 }
   0x3   :  { %s335_s26 = scalar_lea.vmem %s26_s25, 256  ;;  %p340_p1 = scmp.lt.s32.totalorder %s26_s25, %s26_s25 }
   0x4   :  { %p336_p0 = scmp.ne.s32.totalorder %s26_s25, %s335_s26  ;;  %p341_p2 = scmp.lt.s32.totalorder %s335_s26, %s335_s26 }
   0x6   :  { %p342_p3 = por %p341_p2, %p340_p1 }
   0x8   :  { %p343_p4 = pnand %p342_p3, %p336_p0 }
   0xa   :  { %346 = shalt.err (!%p343_p4)
}
   0xb   :  { %s372_s27 = smov 64   ;;  %s373_s28 = smov 4  }
   0xc   :  { %31 = dma.hbm_to_vmem [thread:$0]  %s453_s3, 256, %s26_s25, [#allocation3], %s372_s27, %s372_s27, %s373_s28  }
   0xd   :  { %s374_s8 = smov [#allocation4]  }
   0xe   :  { %s38_s9 = sshll.u32 %s374_s8, 4  ;;  %s39_s9 = int_to_ptr.vmem [resolvable:$true] %s38_s9 }
   0xf   :  { %s355_s10 = scalar_lea.vmem %s39_s9, 16  ;;  %s359_s11 = scalar_lea.vmem %s39_s9, 32 }
  0x10   :  { %p356_p5 = scmp.ne.s32.totalorder %s39_s9, %s355_s10  ;;  %p360_p6 = scmp.lt.s32.totalorder %s39_s9, %s39_s9 }
  0x11   :  { %p361_p7 = scmp.lt.s32.totalorder %s359_s11, %s355_s10 }
  0x13   :  { %p362_p8 = por %p361_p7, %p360_p6 }
  0x15   :  { %p363_p9 = pnand %p362_p8, %p356_p5 }
  0x17   :  { %366 = shalt.err (!%p363_p9)
}
  0x18   :  { %41 = dma.hbm_to_vmem [thread:$0]  %s454_s4, 16, %s39_s9, [#allocation5]  }
  0x19   :  { %367 = dma.done.wait [#allocation3], 256  }
  0x1a   :  { %368 = vsyncadd [#allocation3], 4294967040 }
  0x1b   :  { %369 = dma.done.wait [#allocation5], 16  }
  0x1c   :  { %370 = vsyncadd [#allocation5], 4294967280  ;;  %v375_v0 = vmov 0.0   ;;  %vm376_vm0 = vmmov 0   ;;  %v321_v1 = vld [vmem:[%s451_s1 + $0x8] sm:$0xff]   ;;  %v322_v2 = vld [vmem:[%s451_s1] sm:$0xff]  }
  0x1d   :  { %291 = vmatprep.subr.bf16.mxu0 %v375_v0  ;;  %295 = vmatprep.mubr.msk.bf16.mxu0 %vm376_vm0, %v375_v0  ;;  %v53_v3 = vld [vmem:[%s450_s0] sm:$0xff]  ;;  %vm78_vm1 = vcmask 261120   ;;  %v323_v5 = vld [vmem:[#allocation2 + $0x8] sm:$0xff]   ;;  %v274_v18 = vld [vmem:[#allocation4] ss:$0 sm:$0xff]  ;;  %vm262_vm4 = vcmask 72704  }
  0x1e   :  { %299 = vmatprep.subr.bf16.mxu1 %v375_v0  ;;  %303 = vmatprep.mubr.msk.bf16.mxu1 %vm376_vm0, %v375_v0  ;;  %v54_v4 = vpack.c.bf16 %v53_v3, %v53_v3  ;;  %v324_v6 = vld [vmem:[#allocation2] sm:$0xff]   ;;  %v325_v16 = vld [vmem:[%s455_s5 + $0x8] sm:$0xff]  }
  0x1f   :  { %292 = vmatpush3.bf16.msra.mxu0 %v321_v1  ;;  %300 = vmatpush3.bf16.msra.mxu1 %v323_v5  ;;  %v270_v7 = vld [vmem:[%s452_s2] ss:$0 sm:$0xff] }
  0x20   :  { %293 = vmatprep.subr.bf16.mxu0 %v375_v0  ;;  %301 = vmatprep.subr.bf16.mxu1 %v375_v0  ;;  %v326_v17 = vld [vmem:[%s455_s5] sm:$0xff]  }
  0x21   :  { %v278_v27 = vld [vmem:[%s456_s6] ss:$0 sm:$0xff] }
  0x23   :  { %294 = vmatpush3.bf16.msra.mxu0 %v322_v2  ;;  %302 = vmatpush3.bf16.msra.mxu1 %v324_v6 }
  0x24   :  { %307 = vmatprep.subr.bf16.mxu0 %v375_v0 }
  0x26   :  { %296 = vmatmul.mubr.msk.bf16.vlgmr.msra.gmra.mxu0 %vm78_vm1, %v54_v4 }
  0x27   :  { %311 = vmatprep.mubr.msk.bf16.mxu0 %vm376_vm0, %v375_v0  ;;  %308 = vmatpush3.bf16.msra.mxu0 %v325_v16 }
  0x28   :  { %309 = vmatprep.subr.bf16.mxu0 %v375_v0 }
  0x2b   :  { %310 = vmatpush3.bf16.msra.mxu0 %v326_v17 }
  0xe6   :  { %v116_v8 = vpop.f32.mrf.mxu0 }
  0xe7   :  { %v117_v9 = vadd.f32 %v270_v7, %v116_v8 }
  0xe8   :  { %v297_v10 = vpop.f32.mrf.mxu0 }
  0xe9   :  { %vm122_vm2 = vcmp.gt.f32.partialorder %v117_v9, 0.0  ;;  %v123_v11 = vmul.f32 0.01, %v117_v9 }
  0xea   :  { %v119_v12 = vpop.f32.mrf.mxu0 }
  0xeb   :  { %v124_v13 = vsel %vm122_vm2, %v117_v9, %v123_v11 }
  0xec   :  { %v125_v14 = vpack.c.bf16 %v124_v13, %v124_v13  ;;  %v298_v15 = vpop.f32.mrf.mxu0 }
  0xee   :  { %304 = vmatmul.mubr.msk.bf16.vlgmr.msra.gmra.mxu1 %vm78_vm1, %v125_v14 }
 0x1ae   :  { %v186_v19 = vpop.f32.mrf.mxu1 }
 0x1af   :  { %v187_v20 = vadd.f32 %v274_v18, %v186_v19 }
 0x1b0   :  { %v305_v21 = vpop.f32.mrf.mxu1 }
 0x1b1   :  { %vm192_vm3 = vcmp.gt.f32.partialorder %v187_v20, 0.0  ;;  %v193_v22 = vmul.f32 0.01, %v187_v20 }
 0x1b2   :  { %v189_v23 = vpop.f32.mrf.mxu1 }
 0x1b3   :  { %v194_v24 = vsel %vm192_vm3, %v187_v20, %v193_v22 }
 0x1b4   :  { %v195_v25 = vpack.c.bf16 %v194_v24, %v194_v24  ;;  %v306_v26 = vpop.f32.mrf.mxu1 }
 0x1b6   :  { %312 = vmatmul.mubr.msk.bf16.vlgmr.msra.gmra.mxu0 %vm78_vm1, %v195_v25 }
 0x276   :  { %v256_v28 = vpop.f32.mrf.mxu0 }
 0x277   :  { %v257_v29 = vadd.f32 %v278_v27, %v256_v28 }
 0x278   :  { %v313_v30 = vpop.f32.mrf.mxu0 }
 0x279   :  { %263 = vst.msk [vmem:[%s457_s7] sm:$0xff] %vm262_vm4, %v257_v29 }
 0x27a   :  { %v259_v31 = vpop.f32.mrf.mxu0 }
 0x27c   :  { %v314_v32 = vpop.f32.mrf.mxu0 }
 0x27d   :  { %268 = vsyncpa [#allocation3], 1 }
 0x27e   :  { %269 = vsyncpa [#allocation5], 1 }

</bundles_post_ra>
